<compile_context>
chip_gen: v5e
topology: v5e:2x2
jax: 0.10.0
libtpu: 0.0.40
codegen_flags: <defaults>
</compile_context>

<pallas_src>
import math

import jax
import jax.numpy as jnp
from jax import lax
from jax.experimental import pallas as pl
from jax.experimental.pallas import tpu as pltpu


def _vmem_capacity_bytes():
    """Physical per-core VMEM; conservative 64 MiB fallback if query fails."""
    try:
        info = pltpu.get_tpu_info()
        cap = getattr(info, "vmem_capacity_bytes", None)
        if cap:
            return int(cap)
    except Exception:
        pass
    return 64 * 1024 * 1024


def _step_vmem_bytes(nb, ch, length, itemsize, p_itemsize):
    """VMEM working set of one grid step (one head, nb batches)."""
    blocks = 2 * 4 * nb * ch * length * itemsize          # double-buffered q,k,v,out blocks
    inter = nb * length * length * (4 + p_itemsize)       # f32 scores + exp(probabilities)
    inter += nb * ch * length * 4                         # f32 pre-normalized output
    inter += 2 * nb * length * 4                          # row max / row sum
    return blocks + inter


def _pick_batch_block(bs, n_heads, ch, length, itemsize, p_itemsize, budget):
    """Largest nb dividing bs whose per-step working set fits `budget`,
    keeping at least 2 grid steps (megacore sharding / pipelining)."""
    best = 1
    for cand in range(1, bs + 1):
        if bs % cand:
            continue
        if n_heads * (bs // cand) < 2 <= n_heads * bs:
            continue
        if _step_vmem_bytes(cand, ch, length, itemsize, p_itemsize) <= budget:
            best = cand
    return best


def _make_kernel(scale, in_dtype, p_dtype):
    """One grid step: one head, nb batches. Blocks are (nb, C, T)."""

    def kernel(q_ref, k_ref, v_ref, o_ref):
        # Fold 1/sqrt(C) into the small q tile (stays in the input dtype).
        q = q_ref[...] * jnp.asarray(scale, dtype=in_dtype)
        k = k_ref[...]
        v = v_ref[...]

        # s[b, tk, tq] = sum_c k[b, c, tk] * q[b, c, tq]
        # Contraction over the channel axis is consumed by the MXU natively:
        # no narrow-lane (T, C) transpose tile, no XLU transpose.
        s = lax.dot_general(
            k, q,
            dimension_numbers=(((1,), (1,)), ((0,), (0,))),
            preferred_element_type=jnp.float32)                 # (nb, Tk, Tq) f32

        # Numerically stable softmax over keys (axis 1).  exp runs in p_dtype
        # (bf16 on bf16 inputs -> bf16 EUP path, halves the biggest live
        # buffer); row-sum accumulates in f32; normalization is deferred to
        # the small (nb, C, T) output.
        m = jnp.max(s, axis=1, keepdims=True)                    # (nb, 1, Tq) f32
        p = jnp.exp((s - m).astype(p_dtype))                     # (nb, Tk, Tq)
        l = jnp.sum(p, axis=1, keepdims=True, dtype=jnp.float32)  # (nb, 1, Tq) f32

        # o[b, c, tq] = sum_tk v[b, c, tk] * p[b, tk, tq]
        o = lax.dot_general(
            v, p.astype(in_dtype),
            dimension_numbers=(((2,), (1,)), ((0,), (0,))),
            preferred_element_type=jnp.float32)                  # (nb, C, Tq) f32
        o = o * pl.reciprocal(l, approx=True)                    # deferred normalize (EUP)
        o_ref[...] = o.astype(o_ref.dtype)                       # lane-dense store

    return kernel


def qkv_attention(qkv, n_heads):
    """Pallas equivalent of QKVAttention.forward.

    qkv: [N, 3*H*C, T]  ->  returns [N, H*C, T]
    """
    bs, width, length = qkv.shape
    assert width % (3 * n_heads) == 0
    ch = width // (3 * n_heads)
    hw = n_heads * ch
    itemsize = jnp.dtype(qkv.dtype).itemsize

    # Per-head channel slice must sit on a sublane-tile boundary.
    # TODO(synk): group multiple heads per grid step for unaligned ch (and
    # ideally 16-row alignment for bf16 to avoid split packed-row pairs).
    assert ch % 8 == 0, "per-head channel count must be a multiple of 8"

    p_dtype = jnp.bfloat16 if qkv.dtype == jnp.bfloat16 else jnp.float32
    p_itemsize = jnp.dtype(p_dtype).itemsize

    vmem_cap = _vmem_capacity_bytes()
    budget = max(2 * 1024 * 1024, vmem_cap // 10)   # ~6 MiB on v7x, ~12 MiB on v5e/v6e
    nb = _pick_batch_block(bs, n_heads, ch, length, itemsize, p_itemsize, budget)
    grid = (bs // nb, n_heads)

    # Scoped-VMEM limit: one step's working set + headroom, capped at 75% of
    # physical VMEM (never ask v7x for its entire 64 MiB).
    step_bytes = _step_vmem_bytes(nb, ch, length, itemsize, p_itemsize)
    vmem_limit = max(32 * 1024 * 1024, step_bytes + (8 << 20))
    vmem_limit = int(min(vmem_limit, int(0.75 * vmem_cap)))

    # Advisory cost hint so XLA can overlap this op with surrounding work.
    flops = 4 * bs * n_heads * length * length * ch
    transcendentals = bs * n_heads * length * length
    bytes_accessed = 4 * hw * bs * length * itemsize

    kernel = _make_kernel(1.0 / math.sqrt(ch), qkv.dtype, p_dtype)

    # qkv is passed three times; each spec's channel block index picks the
    # q / k / v slice of the current head h (block size = ch channels).
    q_spec = pl.BlockSpec((nb, ch, length), lambda i, h: (i, h, 0))
    k_spec = pl.BlockSpec((nb, ch, length), lambda i, h: (i, n_heads + h, 0))
    v_spec = pl.BlockSpec((nb, ch, length), lambda i, h: (i, 2 * n_heads + h, 0))
    o_spec = pl.BlockSpec((nb, ch, length), lambda i, h: (i, h, 0))

    return pl.pallas_call(
        kernel,
        out_shape=jax.ShapeDtypeStruct((bs, hw, length), qkv.dtype),
        grid_spec=pltpu.PrefetchScalarGridSpec(
            num_scalar_prefetch=0,
            grid=grid,
            in_specs=[q_spec, k_spec, v_spec],
            out_specs=o_spec,
        ),
        compiler_params=pltpu.CompilerParams(
            dimension_semantics=("parallel", "parallel"),
            vmem_limit_bytes=vmem_limit,
        ),
        cost_estimate=pl.CostEstimate(
            flops=flops,
            transcendentals=transcendentals,
            bytes_accessed=bytes_accessed,
        ),
    )(qkv, qkv, qkv)


def _reference(qkv, n_heads):
    """Pure-JAX reference mirroring the PyTorch forward, for validation."""
    bs, width, length = qkv.shape
    ch = width // (3 * n_heads)
    q, k, v = jnp.split(qkv, 3, axis=1)
    q = jnp.transpose(q.reshape(bs * n_heads, ch, length), (0, 2, 1))
    k = jnp.transpose(k.reshape(bs * n_heads, ch, length), (0, 2, 1))
    v = jnp.transpose(v.reshape(bs * n_heads, ch, length), (0, 2, 1))
    s = jnp.einsum("btc,bsc->bts", q, k) / math.sqrt(ch)
    p = jax.nn.softmax(s, axis=-1)
    a = jnp.einsum("bts,bsc->btc", p, v)
    return jnp.transpose(a, (0, 2, 1)).reshape(bs, -1, length)


if __name__ == "__main__":
    # Small shapes consistent with the module: N=2, H=2, C=32, T=128
    # (T a multiple of 128 for fully lane-dense loads/stores, C a multiple
    #  of 8 so each head's slice sits on a sublane-tile boundary).
    N, H, C, T = 2, 2, 32, 128
    key = jax.random.PRNGKey(0)
    qkv = jax.random.normal(key, (N, 3 * H * C, T), dtype=jnp.float32)

    out = jax.block_until_ready(qkv_attention(qkv, n_heads=H))
    ref = _reference(qkv, n_heads=H)

    assert out.shape == (N, H * C, T)
    # Slightly relaxed tolerance: approx reciprocal + q-folded scaling.
    assert jnp.allclose(out, ref, atol=2e-3, rtol=2e-3), float(jnp.max(jnp.abs(out - ref)))

    print("KERNEL_OK")
</pallas_src>

<mosaic_0001>
module attributes {stable_mosaic.version = 11 : i64} {
  func.func @kernel(%arg0: i32, %arg1: i32, %arg2: memref<2x32x128xf32, #tpu.memory_space<vmem>>, %arg3: memref<2x32x128xf32, #tpu.memory_space<vmem>>, %arg4: memref<2x32x128xf32, #tpu.memory_space<vmem>>, %arg5: memref<2x32x128xf32, #tpu.memory_space<vmem>>) attributes {dimension_semantics = [#tpu.dimension_semantics<parallel>, #tpu.dimension_semantics<parallel>], iteration_bounds = array<i64: 1, 2>, scalar_prefetch = 0 : i64, scratch_operands = 0 : i64, tpu.core_type = #tpu.core_type<tc>, window_params = [{transform_indices = @transform_0, window_bounds = array<i64: 2, 32, 128>}, {transform_indices = @transform_1, window_bounds = array<i64: 2, 32, 128>}, {transform_indices = @transform_2, window_bounds = array<i64: 2, 32, 128>}, {transform_indices = @transform_3, window_bounds = array<i64: 2, 32, 128>}]} {
    %c0 = arith.constant 0 : index
    %c0_0 = arith.constant 0 : index
    %c0_1 = arith.constant 0 : index
    %0 = vector.load %arg2[%c0, %c0_0, %c0_1] : memref<2x32x128xf32, #tpu.memory_space<vmem>>, vector<2x32x128xf32>
    %cst = arith.constant 0.176776692 : f32
    %1 = vector.broadcast %cst : f32 to vector<2x32x128xf32>
    %2 = arith.mulf %0, %1 : vector<2x32x128xf32>
    %c0_2 = arith.constant 0 : index
    %c0_3 = arith.constant 0 : index
    %c0_4 = arith.constant 0 : index
    %3 = vector.load %arg3[%c0_2, %c0_3, %c0_4] : memref<2x32x128xf32, #tpu.memory_space<vmem>>, vector<2x32x128xf32>
    %c0_5 = arith.constant 0 : index
    %c0_6 = arith.constant 0 : index
    %c0_7 = arith.constant 0 : index
    %4 = vector.load %arg4[%c0_5, %c0_6, %c0_7] : memref<2x32x128xf32, #tpu.memory_space<vmem>>, vector<2x32x128xf32>
    %cst_8 = arith.constant dense<0.000000e+00> : vector<2x128x128xf32>
    %5 = tpu.matmul %3, %2, %cst_8 {dimension_numbers = #tpu.dot_dimension_numbers<[1], [1], [2], [2], [0, 0, 0, 2, 1, 2], [0], [0]>} : vector<2x32x128xf32>, vector<2x32x128xf32>, vector<2x128x128xf32> -> vector<2x128x128xf32>
    %cst_9 = arith.constant dense<0xFF800000> : vector<2x128xf32>
    %6 = vector.multi_reduction <maximumf>, %5, %cst_9 [1] : vector<2x128x128xf32> to vector<2x128xf32>
    %7 = vector.shape_cast %6 : vector<2x128xf32> to vector<2x1x128xf32>
    %8 = vector.broadcast %7 : vector<2x1x128xf32> to vector<2x128x128xf32>
    %9 = arith.subf %5, %8 : vector<2x128x128xf32>
    %10 = math.exp %9 : vector<2x128x128xf32>
    %cst_10 = arith.constant dense<0.000000e+00> : vector<2x128xf32>
    %11 = vector.multi_reduction <add>, %10, %cst_10 [1] : vector<2x128x128xf32> to vector<2x128xf32>
    %12 = vector.shape_cast %11 : vector<2x128xf32> to vector<2x1x128xf32>
    %cst_11 = arith.constant dense<0.000000e+00> : vector<2x32x128xf32>
    %13 = tpu.matmul %4, %10, %cst_11 {dimension_numbers = #tpu.dot_dimension_numbers<[2], [1], [1], [2], [0, 0, 0, 1, 1, 2], [0], [0]>} : vector<2x32x128xf32>, vector<2x128x128xf32>, vector<2x32x128xf32> -> vector<2x32x128xf32>
    %14 = tpu.reciprocal %12 {approx = true} : vector<2x1x128xf32> -> vector<2x1x128xf32>
    %15 = vector.broadcast %14 : vector<2x1x128xf32> to vector<2x32x128xf32>
    %16 = arith.mulf %13, %15 : vector<2x32x128xf32>
    %c0_12 = arith.constant 0 : index
    %c0_13 = arith.constant 0 : index
    %c0_14 = arith.constant 0 : index
    %17 = vector.load %arg5[%c0_12, %c0_13, %c0_14] : memref<2x32x128xf32, #tpu.memory_space<vmem>>, vector<2x32x128xf32>
    tpu.vector_store %arg5[%c0_12, %c0_13, %c0_14], %16 {strides = array<i32>} : memref<2x32x128xf32, #tpu.memory_space<vmem>>, vector<2x32x128xf32>,
    return
  }
  func.func @transform_0(%arg0: i32, %arg1: i32) -> (i32, i32, i32) {
    %c0_i32 = arith.constant 0 : i32
    %c0_i32_0 = arith.constant 0 : i32
    return %arg0, %arg1, %c0_i32 : i32, i32, i32
  }
  func.func @transform_1(%arg0: i32, %arg1: i32) -> (i32, i32, i32) {
    %c2_i32 = arith.constant 2 : i32
    %0 = arith.addi %c2_i32, %arg1 : i32
    %c0_i32 = arith.constant 0 : i32
    %c0_i32_0 = arith.constant 0 : i32
    return %arg0, %0, %c0_i32 : i32, i32, i32
  }
  func.func @transform_2(%arg0: i32, %arg1: i32) -> (i32, i32, i32) {
    %c4_i32 = arith.constant 4 : i32
    %0 = arith.addi %c4_i32, %arg1 : i32
    %c0_i32 = arith.constant 0 : i32
    %c0_i32_0 = arith.constant 0 : i32
    return %arg0, %0, %c0_i32 : i32, i32, i32
  }
  func.func @transform_3(%arg0: i32, %arg1: i32) -> (i32, i32, i32) {
    %c0_i32 = arith.constant 0 : i32
    %c0_i32_0 = arith.constant 0 : i32
    return %arg0, %arg1, %c0_i32 : i32, i32, i32
  }
}

</mosaic_0001>

<bundles_post_ra>
// kernel: tpu_custom_call.1
= control target key start
LH: loop header
LB: loop body
LE: loop exit
PB: predicated region body
PF: predicated region fallthrough
CT: control target
= control target key end

     0   :  { %s2211_s0 = inlined_call_operand.hbm [shape: f32[2,192,128], index: 0, kind: input, shape index: {}]   ;;  %s2212_s1 = inlined_call_operand.hbm [shape: f32[2,192,128], index: 1, kind: input, shape index: {}]   ;;  %s2213_s2 = inlined_call_operand.hbm [shape: f32[2,192,128], index: 2, kind: input, shape index: {}]   ;;  %s2214_s3 = inlined_call_operand.hbm [shape: f32[2,64,128], index: 3, kind: output, shape index: {}]  }
   0x1   :  { %2223 = sst [smem:[#allocation32_spill]] %s2211_s0 }
   0x2   :  { %2224 = sst [smem:[#allocation33_spill]] %s2214_s3 }
   0x3   :  { %8 = vsyncpa [#allocation3], 0 }
   0x4   :  { %10 = vsyncpa [#allocation3 + $0x1], 0 }
   0x5   :  { %11 = vsyncpa [#allocation6], 0 }
   0x6   :  { %13 = vsyncpa [#allocation6 + $0x1], 0 }
   0x7   :  { %14 = vsyncpa [#allocation4], 0 }
   0x8   :  { %16 = vsyncpa [#allocation4 + $0x1], 0  ;;  %s1611_s12 = smov 0   ;;  %s1613_s13 = smov 0  }
   0x9   :  { %s1615_s14 = smov 0   ;;  %s1617_s15 = smov 0  }
   0xa   :  { %s1619_s16 = smov 0   ;;  %s1621_s17 = smov 0  }
   0xb   :  { %s1623_s18 = smov 0   ;;  %s1625_s19 = smov 0  }
   0xc   :  { %s1627_s20 = smov 0   ;;  %s1629_s21 = smov 0  }
   0xd   :  { %s1631_s22 = smov 0   ;;  %s1633_s23 = smov 0  }
   0xe LB: > { %2225 = sst [smem:[#allocation24_spill]] %s1544_s18  ;;  %s1672_s24 = sadd.s32 4294967295, %s1564_s23   ;;  %s1564_s23 = sphi %s1633_s23, %s22_s23   ;;  %s1560_s22 = sphi %s1631_s22, %s2253_s22   ;;  %s1556_s21 = sphi %s1629_s21, %s2252_s21   ;;  %s1552_s20 = sphi %s1627_s20, %s2251_s20   ;;  %s1548_s19 = sphi %s1625_s19, %s2261_s19   ;;  %s1544_s18 = sphi %s1623_s18, %s2260_s18   ;;  %s1540_s17 = sphi %s1621_s17, %s2259_s17   ;;  %s1536_s16 = sphi %s1619_s16, %s2258_s16   ;;  %s1532_s15 = sphi %s1617_s15, %s2257_s15   ;;  %s1528_s14 = sphi %s1615_s14, %s2256_s14   ;;  %s1524_s13 = sphi %s1613_s13, %s2255_s13   ;;  %s1520_s12 = sphi %s1611_s12, %s2254_s12  }
   0xf   : > { %2226 = sst [smem:[#allocation25_spill]] %s1552_s20  ;;  %s1152_s25 = sadd.s32 4294967294, %s1564_s23  }
  0x10   : > { %2227 = sst [smem:[#allocation26_spill]] %s1560_s22  ;;  %s31_s26 = sadd.s32 1, %s1560_s22 }
  0x11   : > { %s43_s27 = sadd.s32 1, %s1552_s20  ;;  %p32_p0 = scmp.ge.s32.totalorder %s31_s26, 2 }
  0x12   : > { %p50_p1 = scmp.ne.s32.totalorder %s1552_s20, %s1548_s19  ;;  %p51_p2 = scmp.eq.s32.totalorder %s1564_s23, 0 }
  0x13   : > { %p2215_p3 = scmp.ne.s32.totalorder %s1548_s19, %s1544_s18  ;;  %s2263_s26 = smov (%p32_p0, %s31_s26), 0 }
  0x14   : > { %2228 = sst [smem:[#allocation27_spill]] %s2263_s26  ;;  %p1689_p4 = por %p51_p2, %p50_p1 }
  0x15   : > { %p57_p5 = scmp.eq.s32.totalorder %s1672_s24, 0  ;;  %s39_s29 = ssub.s32 %s1560_s22, %s2263_s26 }
  0x16   : > { %s66_s30 = sadd.s32 2, %s1560_s22  ;;  %p41_p6 = scmp.eq.s32.totalorder %s39_s29, 0 }
  0x17   : > { %p1702_p7 = por %p57_p5, %p2215_p3  ;;  %s67_s5 = sadd.s32 2, %s2263_s26 }
  0x18   : > { %s73_s6 = sadd.s32 1, %s1540_s17  ;;  %s69_s8 = ssub.s32 %s66_s30, %s67_s5 }
  0x19   : > { %s2230_s4 = scalar_select %p1702_p7, 1, 0 }
  0x1a   : > { %s1709_s7 = scalar_select %p41_p6, %s1552_s20, %s43_s27  }
  0x1b   : > { %p80_p8 = scmp.ne.s32.totalorder %s1540_s17, %s1536_s16  ;;  %p71_p9 = scmp.eq.s32.totalorder %s69_s8, 0 }
  0x1c   : > { %2231 = sst [smem:[#allocation28_spill]] %s1709_s7  ;;  %p86_p10 = scmp.ne.s32.totalorder %s1536_s16, %s1532_s15 }
  0x1d   : > { %p1717_p11 = por %p80_p8, %p51_p2  ;;  %s96_s10 = sadd.s32 4, %s1560_s22 }
  0x1e   : > { %s1723_s11 = scalar_select %p71_p9, %s1540_s17, %s73_s6  }
  0x1f   : > { %p1727_p12 = por %p86_p10, %p57_p5  ;;  %s97_s29 = sadd.s32 4, %s2263_s26 }
  0x20   : > { %2233 = sst [smem:[#allocation29_spill]] %s1723_s11  ;;  %s99_s30 = ssub.s32 %s96_s10, %s97_s29 }
  0x21   : > { %s2234_s27 = scalar_select %p1727_p12, 1, 0 }
  0x22   : > { %s103_s5 = sadd.s32 1, %s1528_s14  ;;  %p101_p13 = scmp.eq.s32.totalorder %s99_s30, 0 }
  0x23   : > { %p110_p0 = scmp.ne.s32.totalorder %s1528_s14, %s1524_s13  ;;  %p116_p6 = scmp.ne.s32.totalorder %s1524_s13, %s1520_s12 }
  0x24   : > { %p142_p8 = scmp.eq.s32.totalorder %s1672_s24, 1  ;;  %p148_p12 = scmp.eq.s32.totalorder %s1152_s25, 1 }
  0x25   : > { %s1739_s15 = scalar_select %p101_p13, %s1528_s14, %s103_s5  }
  0x26   : > { %p1743_p3 = por %p110_p0, %p51_p2  ;;  %p1749_p9 = por %p116_p6, %p57_p5 }
  0x27   : > { %2235 = sst [smem:[#allocation30_spill]] %s1739_s15  ;;  %p1756_p10 = por %p142_p8, %p50_p1 }
  0x28   : > { %p2239_p7 = scmp.ne.s32.totalorder %s1548_s19, %s1544_s18  ;;  %p1154_p2 = scmp.ge.s32.totalorder %s1564_s23, 2 }
  0x2a   : > { %p1765_p13 = por %p148_p12, %p2239_p7  ;;  %164 = sbr.rel (%p1154_p2) target bundleno = 90 (0x5a), region = 16 }
  0x2c   : > { %s2240_s12 = scalar_select %p1765_p13, 1, 0 }
  0x2e   : > { %2241 = sst [smem:[#allocation31_spill]] %s2240_s12 }
  0x2f   : > { %s168_s29 = sand.u32 1, %s1552_s20   ;;  %s1774_s30 = sshll.u32 %s1560_s22, 5 }
  0x30   : > { %s1155_s25 = sshll.u32 %s168_s29, 6  ;;  %s2242_s0 = sld [smem:[#allocation32_spill]] }
  0x31   : > { %s1224_s11 = scalar_select %p1689_p4, [#allocation0], [#allocation17] }
  0x32   : > { %s172_s12 = scalar_lea.vmem [#allocation2], %s1155_s25  ;;  %s1566_s22 = smov 3072  }
  0x33   : > { %s195_s18 = sshll.u32 %s172_s12, 4  ;;  %s185_s3 = sld [smem:[%s1224_s11]]   ;;  %s196_s18 = int_to_ptr.vmem [resolvable:$true] %s195_s18 }
  0x34   : > { %1225 = sst [smem:[#allocation10]] (%p1689_p4), %s1566_s22  ;;  %s1567_s20 = smov 512  }
  0x35   : > { %1226 = sst [smem:[#allocation10 + $0x1]] (%p1689_p4), %s1567_s20  ;;  %s1568_s26 = smov 4  }
  0x36   : > { %s180_s7 = scalar_lea.hbm %s2242_s0, %s1774_s30  ;;  %1227 = sst [smem:[#allocation10 + $0x2]] (%p1689_p4), %s1568_s26 }
  0x37   : > { %s193_s15 = sshll.u32 %s180_s7, 4  ;;  %s1569_s5 = smov 128   ;;  %s194_s15 = int_to_ptr.hbm [resolvable:$true] %s193_s15 }
  0x38   : > { %1228 = sst [smem:[#allocation10 + $0x3]] (%p1689_p4), %s1569_s5  ;;  %s1570_s11 = smov 8  }
  0x39   : > { %s1158_s7 = sshll.u32 %s185_s3, 26  ;;  %1229 = sst [smem:[#allocation10 + $0x4]] (%p1689_p4), %s1569_s5 }
  0x3a   : > { %s1159_s12 = sadd.s32 134217728, %s1158_s7  ;;  %1230 = sst [smem:[#allocation10 + $0x5]] (%p1689_p4), %s1570_s11 }
  0x3b   : > { %s169_s25 = scalar_lea.sflag [#allocation3], %s168_s29  ;;  %s1571_s0 = smov [#allocation9]  }
  0x3c   : > { %1231 = dma.general (%p1689_p4), %s194_s15, 1024, %s196_s18, %s169_s25, %s1571_s0, [#allocation10], %s1159_s12, 0  }
  0x3d   : > { %s218_s20 = sand.u32 1, %s1564_s23   ;;  %s220_s22 = sand.u32 1, %s1540_s17  }
  0x3e   : > { %s1160_s3 = sshll.u32 %s220_s22, 6  ;;  %s1058_s7 = scalar_lea.hbm %s2212_s1, %s1774_s30 }
  0x3f   : > { %s1059_s11 = scalar_lea.hbm %s1058_s7, 64  ;;  %s222_s29 = scalar_lea.vmem [#allocation5], %s1160_s3 }
  0x40   : > { %s246_s28 = sshll.u32 %s222_s29, 4  ;;  %s244_s18 = sshll.u32 %s1059_s11, 4  ;;  %s247_s28 = int_to_ptr.vmem [resolvable:$true] %s246_s28  ;;  %s245_s18 = int_to_ptr.hbm [resolvable:$true] %s244_s18 }
  0x41   : > { %s1232_s0 = scalar_select %p1717_p11, [#allocation0], [#allocation18] }
  0x42   : > { %s1572_s12 = smov 3072   ;;  %s1573_s25 = smov 512  }
  0x43   : > { %s236_s15 = sld [smem:[%s1232_s0]]   ;;  %s1574_s22 = smov 4  }
  0x44   : > { %1233 = sst [smem:[#allocation12]] (%p1717_p11), %s1572_s12  ;;  %s1575_s3 = smov 128  }
  0x45   : > { %1234 = sst [smem:[#allocation12 + $0x1]] (%p1717_p11), %s1573_s25  ;;  %s1576_s7 = smov 8  }
  0x46   : > { %1235 = sst [smem:[#allocation12 + $0x2]] (%p1717_p11), %s1574_s22  ;;  %s1816_s11 = scalar_lea.sflag [#allocation6], %s218_s20 }
  0x47   : > { %1236 = sst [smem:[#allocation12 + $0x3]] (%p1717_p11), %s1575_s3  ;;  %s1577_s29 = smov [#allocation11]  }
  0x48   : > { %1237 = sst [smem:[#allocation12 + $0x4]] (%p1717_p11), %s1575_s3 }
  0x49   : > { %s1163_s26 = sshll.u32 %s236_s15, 26  ;;  %1238 = sst [smem:[#allocation12 + $0x5]] (%p1717_p11), %s1576_s7 }
  0x4a   : > { %s1164_s5 = sadd.s32 134217728, %s1163_s26 }
  0x4b   : > { %1239 = dma.general (%p1717_p11), %s245_s18, 1024, %s247_s28, %s1816_s11, %s1577_s29, [#allocation12], %s1164_s5, 0  }
  0x4c   : > { %s271_s0 = sand.u32 1, %s1528_s14   ;;  %s1067_s25 = scalar_lea.hbm %s2213_s2, %s1774_s30 }
  0x4d   : > { %s1165_s22 = sshll.u32 %s271_s0, 6  ;;  %s1068_s3 = scalar_lea.hbm %s1067_s25, 128 }
  0x4e   : > { %s295_s20 = sshll.u32 %s1068_s3, 4  ;;  %s273_s9 = scalar_lea.vmem [#allocation7], %s1165_s22  ;;  %s296_s20 = int_to_ptr.hbm [resolvable:$true] %s295_s20 }
  0x4f   : > { %s1240_s26 = scalar_select %p1743_p3, [#allocation0], [#allocation19] }
  0x50   : > { %s297_s28 = sshll.u32 %s273_s9, 4  ;;  %s1578_s5 = smov 3072   ;;  %s298_s28 = int_to_ptr.vmem [resolvable:$true] %s297_s28 }
  0x51   : > { %s287_s18 = sld [smem:[%s1240_s26]]   ;;  %s1579_s7 = smov 512  }
  0x52   : > { %1241 = sst [smem:[#allocation14]] (%p1743_p3), %s1578_s5  ;;  %s1580_s30 = smov 4  }
  0x53   : > { %1242 = sst [smem:[#allocation14 + $0x1]] (%p1743_p3), %s1579_s7  ;;  %s1581_s29 = smov 128  }
  0x54   : > { %1243 = sst [smem:[#allocation14 + $0x2]] (%p1743_p3), %s1580_s30  ;;  %s1582_s15 = smov 8  }
  0x55   : > { %1244 = sst [smem:[#allocation14 + $0x3]] (%p1743_p3), %s1581_s29  ;;  %s1583_s25 = smov [#allocation13]  }
  0x56   : > { %1245 = sst [smem:[#allocation14 + $0x4]] (%p1743_p3), %s1581_s29 }
  0x57   : > { %s1168_s0 = sshll.u32 %s287_s18, 26  ;;  %1246 = sst [smem:[#allocation14 + $0x5]] (%p1743_p3), %s1582_s15 }
  0x58   : > { %s1169_s12 = sadd.s32 134217728, %s1168_s0 }
  0x59   : > { %1247 = dma.general (%p1743_p3), %s296_s20, 1024, %s298_s28, %s1816_s11, %s1583_s25, [#allocation14], %s1169_s12, 0  }
  0x5a PF: > { %p1170_p1 = scmp.ge.s32.totalorder %s1564_s23, 1  ;;  %p318_p4 = scmp.lt.s32.totalorder %s1564_s23, 3 }
  0x5c   : > { %p319_p5 = pnand %p1170_p1, %p318_p4 }
  0x5d   : > { %s1846_s22 = sand.u32 (!%p319_p5), 1, %s1548_s19   ;;  %p2243_p3 = scmp.ne.s32.totalorder (!%p319_p5), %s2230_s4, 0 }
  0x5e   : > { %322 = sbr.rel (%p319_p5) target bundleno = 756 (0x2f4), region = 32  ;;  %s1171_s3 = sshll.u32 (!%p319_p5), %s1846_s22, 6 }
  0x5f   : > { %s325_s26 = scalar_lea.sflag (!%p319_p5), [#allocation3], %s1846_s22  ;;  %s1852_s9 = scalar_lea.vmem (!%p319_p5), [#allocation2], %s1171_s3 }
  0x63   : > { %1503 = dma.done.wait (%p2243_p3), %s325_s26, 1024  }
  0x64   : > { %1505 = vsyncadd (%p2243_p3), %s325_s26, 4294966272  ;;  %s334_s8 = sand.u32 1, %s1672_s24   ;;  %s336_s11 = sand.u32 1, %s1536_s16  }
  0x65   : > { %s1172_s20 = sshll.u32 %s336_s11, 6  ;;  %s335_s28 = scalar_lea.sflag [#allocation6], %s334_s8 }
  0x66   : > { %s1860_s18 = scalar_lea.vmem [#allocation5], %s1172_s20  ;;  %p2244_p7 = scmp.ne.s32.totalorder %s2234_s27, 0 }
  0x68   : > { %1507 = dma.done.wait (%p2244_p7), %s335_s28, 1024  }
  0x69   : > { %1509 = vsyncadd (%p2244_p7), %s335_s28, 4294966272  ;;  %s346_s5 = sand.u32 1, %s1524_s13  }
  0x6a   : > { %s1173_s7 = sshll.u32 %s346_s5, 6 }
  0x6b   : > { %s1867_s4 = scalar_lea.vmem [#allocation7], %s1173_s7 }
  0x6c   : > { %1511 = dma.done.wait (%p1749_p9), %s335_s28, 1024  }
  0x6d   : > { %1513 = vsyncadd (%p1749_p9), %s335_s28, 4294966272  ;;  %v412_v0 = vld [vmem:[%s1860_s18 + $0x20] sm:$0xff]  ;;  %v395_v2 = vld [vmem:[%s1852_s9 + $0x18] sm:$0xff]  ;;  %vm456_vm0 = vcmask 261120   ;;  %s381_s24 = scalar_lea.vmem [#allocation8], %s1171_s3  ;;  %s972_s27 = scalar_lea.sflag [#allocation4], %s1846_s22 }
  0x6e   : > { %v408_v1 = vld [vmem:[%s1860_s18] sm:$0xff]  ;;  %570 = vxpose.xlu1.b32.start [1/4] (short) %v412_v0, 128  ;;  %v403_v3 = vmul.f32 0.17677669, %v395_v2  ;;  %v399_v4 = vld [vmem:[%s1852_s9 + $0x38] sm:$0xff]  ;;  %v394_v5 = vld [vmem:[%s1852_s9 + $0x10] sm:$0xff] }
  0x6f   : > { %424 = vxpose.xlu0.b32.start [1/4] (short) %v408_v1, 128  ;;  %v398_v6 = vld [vmem:[%s1852_s9 + $0x30] sm:$0xff]  ;;  %v407_v7 = vmul.f32 0.17677669, %v399_v4  ;;  %v402_v8 = vmul.f32 0.17677669, %v394_v5  ;;  %v393_v10 = vld [vmem:[%s1852_s9 + $0x8] sm:$0xff] }
  0x70   : > { %v406_v9 = vmul.f32 0.17677669, %v398_v6  ;;  %517 = vmatpush.msra.mxu0 %v403_v3  ;;  %v397_v11 = vld [vmem:[%s1852_s9 + $0x28] sm:$0xff]  ;;  %1216 = vmatpush.msra.mxu2 %v403_v3  ;;  %v401_v14 = vmul.f32 0.17677669, %v393_v10  ;;  %v414_v16 = vld [vmem:[%s1860_s18 + $0x30] sm:$0xff] }
  0x71   : > { %v413_v12 = vld [vmem:[%s1860_s18 + $0x28] sm:$0xff]  ;;  %662 = vmatpush.msra.mxu1 %v407_v7  ;;  %v405_v15 = vmul.f32 0.17677669, %v397_v11  ;;  %1220 = vmatpush.msra.mxu3 %v407_v7  ;;  %v410_v17 = vld [vmem:[%s1860_s18 + $0x10] sm:$0xff]  ;;  %v415_v18 = vld [vmem:[%s1860_s18 + $0x38] sm:$0xff] }
  0x72   : > { %v409_v13 = vld [vmem:[%s1860_s18 + $0x8] sm:$0xff]  ;;  %518 = vmatpush.msra.mxu0 %v402_v8  ;;  %1217 = vmatpush.msra.mxu2 %v402_v8  ;;  %v411_v19 = vld [vmem:[%s1860_s18 + $0x18] sm:$0xff]  ;;  %v392_v20 = vld [vmem:[%s1852_s9] sm:$0xff] }
  0x73   : > { %663 = vmatpush.msra.mxu1 %v406_v9  ;;  %1221 = vmatpush.msra.mxu3 %v406_v9  ;;  %v396_v21 = vld [vmem:[%s1852_s9 + $0x20] sm:$0xff]  ;;  %v400_v22 = vmul.f32 0.17677669, %v392_v20 }
  0x74   : > { %519 = vmatpush.msra.mxu0 %v401_v14  ;;  %1218 = vmatpush.msra.mxu2 %v401_v14  ;;  %v404_v23 = vmul.f32 0.17677669, %v396_v21 }
  0x75   : > { %664 = vmatpush.msra.mxu1 %v405_v15  ;;  %1222 = vmatpush.msra.mxu3 %v405_v15 }
  0x76   : > { %571 = vxpose.xlu1.b32.cont [2/4] (short) %v413_v12, 128  ;;  %520 = vmatpush.msra.mxu0 %v400_v22 }
  0x77   : > { %425 = vxpose.xlu0.b32.cont [2/4] (short) %v409_v13, 128  ;;  %665 = vmatpush.msra.mxu1 %v404_v23 }
  0x78   : > { %1223 = vmatpush.msra.mxu3 %v404_v23  ;;  %1219 = vmatpush.msra.mxu2 %v400_v22 }
  0x7e   : > { %572 = vxpose.xlu1.b32.cont [3/4] (short) %v414_v16, 128 }
  0x7f   : > { %426 = vxpose.xlu0.b32.cont [3/4] (short) %v410_v17, 128 }
  0x86   : > { %573 = vxpose.xlu1.b32.end [4/4] (short) %v415_v18, 128 }
  0x87   : > { %427 = vxpose.xlu0.b32.end [4/4] (short) %v411_v19, 128 }
 0x112   : > { %v586_v24 = vpop.trf.xlu1 }
 0x113   : > { %v440_v25 = vpop.trf.xlu0  ;;  %1191 = vmatmul.msk.f32.vlgmr.msra.gmra.mxu1 %vm456_vm0, %v586_v24 }
 0x114   : > { %1175 = vmatmul.msk.f32.vlgmr.msra.gmra.mxu0 %vm456_vm0, %v440_v25 }
 0x11a   : > { %v587_v26 = vpop.trf.xlu1 }
 0x11b   : > { %v441_v27 = vpop.trf.xlu0  ;;  %1192 = vmatmul.msk.f32.gmra.mxu1 %vm456_vm0, %v587_v26 }
 0x11c   : > { %1176 = vmatmul.msk.f32.gmra.mxu0 %vm456_vm0, %v441_v27 }
 0x122   : > { %v588_v28 = vpop.trf.xlu1 }
 0x123   : > { %v442_v29 = vpop.trf.xlu0  ;;  %1193 = vmatmul.msk.f32.gmra.mxu1 %vm456_vm0, %v588_v28 }
 0x124   : > { %1177 = vmatmul.msk.f32.gmra.mxu0 %vm456_vm0, %v442_v29 }
 0x12a   : > { %v589_v30 = vpop.trf.xlu1 }
 0x12b   : > { %v443_v31 = vpop.trf.xlu0  ;;  %1194 = vmatmul.msk.f32.gmra.mxu1 %vm456_vm0, %v589_v30 }
 0x12c   : > { %1178 = vmatmul.msk.f32.gmra.mxu0 %vm456_vm0, %v443_v31 }
 0x132   : > { %v590_v32 = vpop.trf.xlu1 }
 0x133   : > { %v444_v33 = vpop.trf.xlu0  ;;  %1195 = vmatmul.msk.f32.gmra.mxu1 %vm456_vm0, %v590_v32 }
 0x134   : > { %1179 = vmatmul.msk.f32.gmra.mxu0 %vm456_vm0, %v444_v33 }
 0x13a   : > { %v591_v34 = vpop.trf.xlu1 }
 0x13b   : > { %v445_v35 = vpop.trf.xlu0  ;;  %1196 = vmatmul.msk.f32.gmra.mxu1 %vm456_vm0, %v591_v34 }
 0x13c   : > { %1180 = vmatmul.msk.f32.gmra.mxu0 %vm456_vm0, %v445_v35 }
 0x142   : > { %v592_v36 = vpop.trf.xlu1 }
 0x143   : > { %v446_v37 = vpop.trf.xlu0  ;;  %1197 = vmatmul.msk.f32.gmra.mxu1 %vm456_vm0, %v592_v36 }
 0x144   : > { %1181 = vmatmul.msk.f32.gmra.mxu0 %vm456_vm0, %v446_v37 }
 0x14a   : > { %v593_v38 = vpop.trf.xlu1 }
 0x14b   : > { %v447_v39 = vpop.trf.xlu0  ;;  %1198 = vmatmul.msk.f32.gmra.mxu1 %vm456_vm0, %v593_v38 }
 0x14c   : > { %1182 = vmatmul.msk.f32.gmra.mxu0 %vm456_vm0, %v447_v39 }
 0x152   : > { %v594_v40 = vpop.trf.xlu1 }
 0x153   : > { %v448_v41 = vpop.trf.xlu0  ;;  %1199 = vmatmul.msk.f32.gmra.mxu1 %vm456_vm0, %v594_v40 }
 0x154   : > { %1183 = vmatmul.msk.f32.gmra.mxu0 %vm456_vm0, %v448_v41 }
 0x15a   : > { %v595_v42 = vpop.trf.xlu1 }
 0x15b   : > { %v449_v43 = vpop.trf.xlu0  ;;  %1200 = vmatmul.msk.f32.gmra.mxu1 %vm456_vm0, %v595_v42 }
 0x15c   : > { %1184 = vmatmul.msk.f32.gmra.mxu0 %vm456_vm0, %v449_v43 }
 0x162   : > { %v596_v44 = vpop.trf.xlu1 }
 0x163   : > { %v450_v45 = vpop.trf.xlu0  ;;  %1201 = vmatmul.msk.f32.vlgmr.msra.gmra.mxu3 %vm456_vm0, %v596_v44 }
 0x164   : > { %1185 = vmatmul.msk.f32.gmra.mxu0 %vm456_vm0, %v450_v45 }
 0x16a   : > { %v597_v46 = vpop.trf.xlu1 }
 0x16b   : > { %v451_v47 = vpop.trf.xlu0  ;;  %1202 = vmatmul.msk.f32.gmra.mxu3 %vm456_vm0, %v597_v46 }
 0x16c   : > { %1186 = vmatmul.msk.f32.vlgmr.msra.gmra.mxu2 %vm456_vm0, %v451_v47 }
 0x172   : > { %v598_v48 = vpop.trf.xlu1 }
 0x173   : > { %v452_v49 = vpop.trf.xlu0  ;;  %1203 = vmatmul.msk.f32.gmra.mxu3 %vm456_vm0, %v598_v48 }
 0x174   : > { %1187 = vmatmul.msk.f32.gmra.mxu2 %vm456_vm0, %v452_v49 }
 0x17a   : > { %v599_v50 = vpop.trf.xlu1 }
 0x17b   : > { %v453_v51 = vpop.trf.xlu0  ;;  %1204 = vmatmul.msk.f32.gmra.mxu3 %vm456_vm0, %v599_v50 }
 0x17c   : > { %1188 = vmatmul.msk.f32.gmra.mxu2 %vm456_vm0, %v453_v51 }
 0x182   : > { %v600_v52 = vpop.trf.xlu1 }
 0x183   : > { %v454_v53 = vpop.trf.xlu0  ;;  %1205 = vmatmul.msk.f32.gmra.mxu3 %vm456_vm0, %v600_v52 }
 0x184   : > { %1189 = vmatmul.msk.f32.gmra.mxu2 %vm456_vm0, %v454_v53 }
 0x18a   : > { %v601_v54 = vpop.trf.xlu1 }
 0x18b   : > { %v455_v55 = vpop.trf.xlu0  ;;  %1206 = vmatmul.msk.f32.gmra.mxu3 %vm456_vm0, %v601_v54 }
 0x18c   : > { %1190 = vmatmul.msk.f32.gmra.mxu2 %vm456_vm0, %v455_v55 }
 0x190   : > { %v1923_v57 = vpop.f32.mrf.mxu1 }
 0x191   : > { %v1921_v56 = vpop.f32.mrf.mxu0 }
 0x198   : > { %v1927_v59 = vpop.f32.mrf.mxu1 }
 0x199   : > { %v1925_v58 = vpop.f32.mrf.mxu0 }
 0x1a0   : > { %v1931_v61 = vpop.f32.mrf.mxu1 }
 0x1a1   : > { %v1929_v60 = vpop.f32.mrf.mxu0  ;;  %v736_v19 = vmax.f32 %v1923_v57, %v1931_v61 }
 0x1a2   : > { %v715_v18 = vmax.f32 %v1921_v56, %v1929_v60 }
 0x1a8   : > { %v1935_v63 = vpop.f32.mrf.mxu1 }
 0x1a9   : > { %v1933_v62 = vpop.f32.mrf.mxu0  ;;  %v737_v21 = vmax.f32 %v1927_v59, %v1935_v63 }
 0x1aa   : > { %v716_v20 = vmax.f32 %v1925_v58, %v1933_v62 }
 0x1b0   : > { %v1939_v1 = vpop.f32.mrf.mxu1 }
 0x1b1   : > { %v1937_v0 = vpop.f32.mrf.mxu0  ;;  %v738_v23 = vmax.f32 %v736_v19, %v1939_v1 }
 0x1b2   : > { %v717_v22 = vmax.f32 %v715_v18, %v1937_v0 }
 0x1b8   : > { %v1943_v3 = vpop.f32.mrf.mxu1 }
 0x1b9   : > { %v1941_v2 = vpop.f32.mrf.mxu0  ;;  %v739_v25 = vmax.f32 %v737_v21, %v1943_v3 }
 0x1ba   : > { %v718_v24 = vmax.f32 %v716_v20, %v1941_v2 }
 0x1c0   : > { %v1949_v6 = vpop.f32.mrf.mxu1 }
 0x1c1   : > { %v1945_v4 = vpop.f32.mrf.mxu0  ;;  %v740_v30 = vmax.f32 %v738_v23, %v1949_v6 }
 0x1c2   : > { %v719_v29 = vmax.f32 %v717_v22, %v1945_v4 }
 0x1c8   : > { %v1957_v10 = vpop.f32.mrf.mxu1 }
 0x1c9   : > { %v1951_v7 = vpop.f32.mrf.mxu0  ;;  %v741_v32 = vmax.f32 %v739_v25, %v1957_v10 }
 0x1ca   : > { %v720_v31 = vmax.f32 %v718_v24, %v1951_v7 }
 0x1d0   : > { %v1965_v14 = vpop.f32.mrf.mxu1 }
 0x1d1   : > { %v1959_v11 = vpop.f32.mrf.mxu0  ;;  %v742_v35 = vmax.f32 %v740_v30, %v1965_v14 }
 0x1d2   : > { %v721_v34 = vmax.f32 %v719_v29, %v1959_v11 }
 0x1d8   : > { %v1985_v26 = vpop.f32.mrf.mxu1 }
 0x1d9   : > { %v1967_v15 = vpop.f32.mrf.mxu0  ;;  %v743_v37 = vmax.f32 %v741_v32, %v1985_v26 }
 0x1da   : > { %v722_v36 = vmax.f32 %v720_v31, %v1967_v15 }
 0x1e1   : > { %v1991_v33 = vpop.f32.mrf.mxu0 }
 0x1e2   : > { %v723_v38 = vmax.f32 %v721_v34, %v1991_v33 }
 0x1e6   : > { %v1947_v5 = vpop.f32.mrf.mxu3 }
 0x1e7   : > { %v744_v39 = vmax.f32 %v742_v35, %v1947_v5 }
 0x1ee   : > { %v1955_v9 = vpop.f32.mrf.mxu3 }
 0x1ef   : > { %v1953_v8 = vpop.f32.mrf.mxu2  ;;  %v745_v41 = vmax.f32 %v743_v37, %v1955_v9 }
 0x1f0   : > { %v724_v40 = vmax.f32 %v722_v36, %v1953_v8 }
 0x1f6   : > { %v1963_v13 = vpop.f32.mrf.mxu3 }
 0x1f7   : > { %v1961_v12 = vpop.f32.mrf.mxu2  ;;  %v746_v43 = vmax.f32 %v744_v39, %v1963_v13 }
 0x1f8   : > { %v725_v42 = vmax.f32 %v723_v38, %v1961_v12 }
 0x1fe   : > { %v1971_v17 = vpop.f32.mrf.mxu3 }
 0x1ff   : > { %v1969_v16 = vpop.f32.mrf.mxu2  ;;  %v747_v45 = vmax.f32 %v745_v41, %v1971_v17 }
 0x200   : > { %v726_v44 = vmax.f32 %v724_v40, %v1969_v16 }
 0x206   : > { %v709_v28 = vpop.f32.mrf.mxu3 }
 0x207   : > { %v564_v27 = vpop.f32.mrf.mxu2  ;;  %v748_v49 = vmax.f32 %v746_v43, %v709_v28 }
 0x208   : > { %v727_v48 = vmax.f32 %v725_v42, %v564_v27 }
 0x20e   : > { %v712_v47 = vpop.f32.mrf.mxu3 }
 0x20f   : > { %v567_v46 = vpop.f32.mrf.mxu2  ;;  %v749_v51 = vmax.f32 %v747_v45, %v712_v47 }
 0x210   : > { %v728_v50 = vmax.f32 %v726_v44, %v567_v46 }
 0x211   : > { %v750_v53 = vmax.f32 %v748_v49, %v749_v51 }
 0x212   : > { %v729_v52 = vmax.f32 %v727_v48, %v728_v50 }
 0x213   : > { %v751_v55 = vrot.slane %v750_v53, 4 }
 0x214   : > { %v730_v54 = vrot.slane %v729_v52, 4 }
 0x215   : > { %v752_v19 = vmax.f32 %v750_v53, %v751_v55 }
 0x216   : > { %v731_v18 = vmax.f32 %v729_v52, %v730_v54 }
 0x217   : > { %v753_v21 = vrot.slane %v752_v19, 2 }
 0x218   : > { %v732_v20 = vrot.slane %v731_v18, 2 }
 0x219   : > { %v754_v23 = vmax.f32 %v752_v19, %v753_v21 }
 0x21a   : > { %v733_v22 = vmax.f32 %v731_v18, %v732_v20 }
 0x21b   : > { %v755_v25 = vrot.slane %v754_v23, 1 }
 0x21c   : > { %v734_v24 = vrot.slane %v733_v22, 1 }
 0x21d   : > { %v2007_v30 = vmax.f32 %v754_v23, %v755_v25 }
 0x21e   : > { %v2005_v29 = vmax.f32 %v733_v22, %v734_v24 }
 0x21f   : > { %v788_v32 = vsub.f32 %v712_v47, %v2007_v30  ;;  %v787_v35 = vsub.f32 %v709_v28, %v2007_v30  ;;  %v786_v37 = vsub.f32 %v1971_v17, %v2007_v30  ;;  %v785_v43 = vsub.f32 %v1963_v13, %v2007_v30 }
 0x220   : > { %v772_v31 = vsub.f32 %v567_v46, %v2005_v29  ;;  %v771_v34 = vsub.f32 %v564_v27, %v2005_v29  ;;  %v770_v36 = vsub.f32 %v1969_v16, %v2005_v29  ;;  %v769_v41 = vsub.f32 %v1961_v12, %v2005_v29 }
 0x221   : > { %v851_v39 = vmul.f32 1.442695, %v788_v32  ;;  %v849_v42 = vmul.f32 1.442695, %v787_v35  ;;  %v768_v28 = vsub.f32 %v1953_v8, %v2005_v29  ;;  %v847_v16 = vmul.f32 1.442695, %v786_v37 }
 0x222   : > { %v819_v38 = vmul.f32 1.442695, %v772_v31  ;;  %v817_v40 = vmul.f32 1.442695, %v771_v34  ;;  %v815_v27 = vmul.f32 1.442695, %v770_v36  ;;  %v784_v17 = vsub.f32 %v1955_v9, %v2007_v30 }
 0x223   : > { %v813_v44 = vmul.f32 1.442695, %v769_v41  ;;  %v767_v45 = vsub.f32 %v1991_v33, %v2005_v29  ;;  %v845_v12 = vmul.f32 1.442695, %v785_v43  ;;  %v783_v13 = vsub.f32 %v1947_v5, %v2007_v30 }
 0x224   : > { %1386 = vpow2.f32 %v819_v38  ;;  %v811_v46 = vmul.f32 1.442695, %v768_v28  ;;  %v766_v8 = vsub.f32 %v1967_v15, %v2005_v29  ;;  %v843_v47 = vmul.f32 1.442695, %v784_v17 }
 0x225   : > { %1388 = vpow2.f32 %v851_v39  ;;  %v782_v9 = vsub.f32 %v1985_v26, %v2007_v30  ;;  %v809_v49 = vmul.f32 1.442695, %v767_v45  ;;  %v765_v33 = vsub.f32 %v1959_v11, %v2005_v29 }
 0x226   : > { %1390 = vpow2.f32 %v817_v40  ;;  %v841_v5 = vmul.f32 1.442695, %v783_v13  ;;  %v781_v15 = vsub.f32 %v1965_v14, %v2007_v30  ;;  %v807_v26 = vmul.f32 1.442695, %v766_v8 }
 0x227   : > { %1392 = vpow2.f32 %v849_v42  ;;  %v764_v52 = vsub.f32 %v1951_v7, %v2005_v29  ;;  %v839_v11 = vmul.f32 1.442695, %v782_v9  ;;  %v780_v54 = vsub.f32 %v1957_v10, %v2007_v30 }
 0x228   : > { %1394 = vpow2.f32 %v815_v27  ;;  %v805_v14 = vmul.f32 1.442695, %v765_v33  ;;  %v763_v18 = vsub.f32 %v1945_v4, %v2005_v29  ;;  %v837_v7 = vmul.f32 1.442695, %v781_v15 }
 0x229   : > { %1396 = vpow2.f32 %v847_v16  ;;  %v779_v20 = vsub.f32 %v1949_v6, %v2007_v30  ;;  %v803_v10 = vmul.f32 1.442695, %v764_v52  ;;  %v762_v22 = vsub.f32 %v1941_v2, %v2005_v29 }
 0x22a   : > { %v2033_v48 = vpop.eup %1386  ;;  %1398 = vpow2.f32 %v813_v44  ;;  %v835_v4 = vmul.f32 1.442695, %v780_v54  ;;  %v778_v24 = vsub.f32 %v1943_v3, %v2007_v30  ;;  %v801_v6 = vmul.f32 1.442695, %v763_v18 }
 0x22b   : > { %v2037_v50 = vpop.eup %1388  ;;  %895 = vmatpush.msrb.mxu2 %v2033_v48  ;;  %1400 = vpow2.f32 %v845_v12  ;;  %v761_v31 = vsub.f32 %v1937_v0, %v2005_v29  ;;  %v833_v2 = vmul.f32 1.442695, %v779_v20  ;;  %v777_v34 = vsub.f32 %v1939_v1, %v2007_v30 }
 0x22c   : > { %v2042_v51 = vpop.eup %1390  ;;  %924 = vmatpush.msrb.mxu3 %v2037_v50  ;;  %1402 = vpow2.f32 %v811_v46  ;;  %v799_v3 = vmul.f32 1.442695, %v762_v22  ;;  %v760_v36 = vsub.f32 %v1933_v62, %v2005_v29  ;;  %v831_v0 = vmul.f32 1.442695, %v778_v24 }
 0x22d   : > { %v2047_v53 = vpop.eup %1392  ;;  %896 = vmatpush.msrb.mxu2 %v2042_v51  ;;  %1404 = vpow2.f32 %v843_v47  ;;  %v776_v38 = vsub.f32 %v1935_v63, %v2007_v30  ;;  %v797_v1 = vmul.f32 1.442695, %v761_v31  ;;  %v759_v40 = vsub.f32 %v1929_v60, %v2005_v29  ;;  %v417_v31 = vld [vmem:[%s1867_s4 + $0x8] sm:$0xff] }
 0x22e   : > { %v2052_v55 = vpop.eup %1394  ;;  %925 = vmatpush.msrb.mxu3 %v2047_v53  ;;  %1406 = vpow2.f32 %v809_v49  ;;  %v829_v62 = vmul.f32 1.442695, %v777_v34  ;;  %v775_v42 = vsub.f32 %v1931_v61, %v2007_v30  ;;  %v795_v63 = vmul.f32 1.442695, %v760_v36  ;;  %v421_v34 = vld [vmem:[%s1867_s4 + $0x28] sm:$0xff] }
 0x22f   : > { %v2057_v19 = vpop.eup %1396  ;;  %897 = vmatpush.msrb.mxu2 %v2052_v55  ;;  %1408 = vpow2.f32 %v841_v5  ;;  %v758_v27 = vsub.f32 %v1925_v58, %v2005_v29  ;;  %v827_v60 = vmul.f32 1.442695, %v776_v38  ;;  %v774_v16 = vsub.f32 %v1927_v59, %v2007_v30 }
 0x230   : > { %v2062_v21 = vpop.eup %1398  ;;  %926 = vmatpush.msrb.mxu3 %v2057_v19  ;;  %1410 = vpow2.f32 %v807_v26  ;;  %v793_v61 = vmul.f32 1.442695, %v759_v40  ;;  %v757_v44 = vsub.f32 %v1921_v56, %v2005_v29  ;;  %v825_v58 = vmul.f32 1.442695, %v775_v42  ;;  %v418_v42 = vld [vmem:[%s1867_s4 + $0x10] sm:$0xff] }
 0x231   : > { %v2067_v23 = vpop.eup %1400  ;;  %898 = vmatpush.msrb.mxu2 %v2062_v21  ;;  %1412 = vpow2.f32 %v839_v11  ;;  %v773_v12 = vsub.f32 %v1923_v57, %v2007_v30  ;;  %v791_v59 = vmul.f32 1.442695, %v758_v27  ;;  %v823_v8 = vmul.f32 1.442695, %v774_v16  ;;  %v416_v11 = vld [vmem:[%s1867_s4] sm:$0xff]  ;;  %v422_v27 = vld [vmem:[%s1867_s4 + $0x30] sm:$0xff] }
 0x232   : > { %v2072_v25 = vpop.eup %1402  ;;  %927 = vmatpush.msrb.mxu3 %v2067_v23  ;;  %1414 = vpow2.f32 %v805_v14  ;;  %v789_v56 = vmul.f32 1.442695, %v757_v44  ;;  %v420_v14 = vld [vmem:[%s1867_s4 + $0x20] sm:$0xff] }
 0x233   : > { %v2077_v32 = vpop.eup %1404  ;;  %899 = vmatpush.msrb.mxu2 %v2072_v25  ;;  %1416 = vpow2.f32 %v837_v7  ;;  %v821_v9 = vmul.f32 1.442695, %v773_v12  ;;  %v423_v12 = vld [vmem:[%s1867_s4 + $0x38] sm:$0xff] }
 0x234   : > { %v2082_v35 = vpop.eup %1406  ;;  %928 = vmatpush.msrb.mxu3 %v2077_v32  ;;  %1418 = vpow2.f32 %v803_v10 }
 0x235   : > { %v2087_v37 = vpop.eup %1408  ;;  %900 = vmatpush.msrb.mxu2 %v2082_v35  ;;  %1420 = vpow2.f32 %v835_v4 }
 0x236   : > { %v2092_v39 = vpop.eup %1410  ;;  %929 = vmatpush.msrb.mxu3 %v2087_v37  ;;  %1422 = vpow2.f32 %v801_v6 }
 0x237   : > { %v2097_v41 = vpop.eup %1412  ;;  %901 = vmatpush.msrb.mxu2 %v2092_v39  ;;  %1424 = vpow2.f32 %v833_v2 }
 0x238   : > { %v2102_v43 = vpop.eup %1414  ;;  %930 = vmatpush.msrb.mxu3 %v2097_v41  ;;  %1426 = vpow2.f32 %v799_v3 }
 0x239   : > { %v2107_v28 = vpop.eup %1416  ;;  %902 = vmatpush.msrb.mxu2 %v2102_v43  ;;  %1428 = vpow2.f32 %v831_v0 }
 0x23a   : > { %v2112_v17 = vpop.eup %1418  ;;  %931 = vmatpush.msrb.mxu3 %v2107_v28  ;;  %1430 = vpow2.f32 %v797_v1 }
 0x23b   : > { %v2117_v45 = vpop.eup %1420  ;;  %903 = vmatpush.msrb.mxu2 %v2112_v17  ;;  %1432 = vpow2.f32 %v829_v62 }
 0x23c   : > { %v1423_v13 = vpop.eup %1422  ;;  %932 = vmatpush.msrb.mxu3 %v2117_v45  ;;  %1434 = vpow2.f32 %v795_v63 }
 0x23d   : > { %v1425_v46 = vpop.eup %1424  ;;  %904 = vmatpush.msrb.mxu2 %v1423_v13  ;;  %1436 = vpow2.f32 %v827_v60 }
 0x23e   : > { %v1427_v47 = vpop.eup %1426  ;;  %933 = vmatpush.msrb.mxu3 %v1425_v46  ;;  %1438 = vpow2.f32 %v793_v61 }
 0x23f   : > { %v1429_v29 = vpop.eup %1428  ;;  %905 = vmatpush.msrb.mxu2 %v1427_v47  ;;  %1440 = vpow2.f32 %v825_v58  ;;  %v419_v58 = vld [vmem:[%s1867_s4 + $0x18] sm:$0xff] }
 0x240   : > { %v1431_v49 = vpop.eup %1430  ;;  %934 = vmatpush.msrb.mxu3 %v1429_v29  ;;  %1442 = vpow2.f32 %v791_v59 }
 0x241   : > { %v1433_v57 = vpop.eup %1432  ;;  %906 = vmatpush.msrb.mxu2 %v1431_v49  ;;  %1444 = vpow2.f32 %v823_v8 }
 0x242   : > { %v1435_v30 = vpop.eup %1434  ;;  %935 = vmatpush.msrb.mxu3 %v1433_v57  ;;  %1446 = vpow2.f32 %v789_v56 }
 0x243   : > { %v1437_v33 = vpop.eup %1436  ;;  %907 = vmatpush.msrb.mxu2 %v1435_v30  ;;  %1448 = vpow2.f32 %v821_v9 }
 0x244   : > { %v1439_v5 = vpop.eup %1438  ;;  %936 = vmatpush.msrb.mxu3 %v1437_v33 }
 0x245   : > { %v1441_v15 = vpop.eup %1440  ;;  %908 = vmatpush.msrb.mxu2 %v1439_v5 }
 0x246   : > { %v1443_v26 = vpop.eup %1442  ;;  %937 = vmatpush.msrb.mxu3 %v1441_v15 }
 0x247   : > { %v1445_v52 = vpop.eup %1444  ;;  %909 = vmatpush.msrb.mxu2 %v1443_v26 }
 0x248   : > { %v1447_v54 = vpop.eup %1446  ;;  %938 = vmatpush.msrb.mxu3 %v1445_v52 }
 0x249   : > { %v1449_v18 = vpop.eup %1448  ;;  %v853_v7 = vadd.f32 %v1447_v54, %v1443_v26  ;;  %910 = vmatpush.msrb.mxu2 %v1447_v54 }
 0x24a   : > { %v874_v20 = vadd.f32 %v1449_v18, %v1445_v52  ;;  %939 = vmatpush.msrb.mxu3 %v1449_v18  ;;  %911 = vmatmul.f32.vlgmr.msrb.gmra.mxu2 %v416_v11 }
 0x24b   : > { %v854_v10 = vadd.f32 %v1439_v5, %v853_v7  ;;  %940 = vmatmul.f32.vlgmr.msrb.gmra.mxu3 %v420_v14 }
 0x24c   : > { %v875_v22 = vadd.f32 %v1441_v15, %v874_v20 }
 0x24d   : > { %v855_v4 = vadd.f32 %v1435_v30, %v854_v10 }
 0x24e   : > { %v876_v24 = vadd.f32 %v1437_v33, %v875_v22 }
 0x24f   : > { %v856_v6 = vadd.f32 %v1431_v49, %v855_v4 }
 0x250   : > { %v877_v2 = vadd.f32 %v1433_v57, %v876_v24 }
 0x251   : > { %v857_v3 = vadd.f32 %v1427_v47, %v856_v6 }
 0x252   : > { %v878_v36 = vadd.f32 %v1429_v29, %v877_v2  ;;  %914 = vmatmul.f32.gmra.mxu2 %v417_v31 }
 0x253   : > { %v858_v0 = vadd.f32 %v1423_v13, %v857_v3  ;;  %943 = vmatmul.f32.gmra.mxu3 %v421_v34 }
 0x254   : > { %v879_v38 = vadd.f32 %v1425_v46, %v878_v36 }
 0x255   : > { %v859_v1 = vadd.f32 %v2112_v17, %v858_v0 }
 0x256   : > { %v880_v40 = vadd.f32 %v2117_v45, %v879_v38 }
 0x257   : > { %v860_v62 = vadd.f32 %v2102_v43, %v859_v1 }
 0x258   : > { %v881_v63 = vadd.f32 %v2107_v28, %v880_v40 }
 0x259   : > { %v861_v60 = vadd.f32 %v2092_v39, %v860_v62 }
 0x25a   : > { %v882_v16 = vadd.f32 %v2097_v41, %v881_v63  ;;  %917 = vmatmul.f32.gmra.mxu2 %v418_v42 }
 0x25b   : > { %v862_v61 = vadd.f32 %v2082_v35, %v861_v60  ;;  %946 = vmatmul.f32.gmra.mxu3 %v422_v27 }
 0x25c   : > { %v883_v44 = vadd.f32 %v2087_v37, %v882_v16 }
 0x25d   : > { %v863_v17 = vadd.f32 %v2072_v25, %v862_v61 }
 0x25e   : > { %v884_v45 = vadd.f32 %v2077_v32, %v883_v44 }
 0x25f   : > { %v864_v43 = vadd.f32 %v2062_v21, %v863_v17 }
 0x260   : > { %v885_v28 = vadd.f32 %v2067_v23, %v884_v45 }
 0x261   : > { %v865_v39 = vadd.f32 %v2052_v55, %v864_v43 }
 0x262   : > { %v886_v41 = vadd.f32 %v2057_v19, %v885_v28  ;;  %920 = vmatmul.f32.gmra.mxu2 %v419_v58 }
 0x263   : > { %949 = vmatmul.f32.gmra.mxu3 %v423_v12  ;;  %v866_v35 = vadd.f32 %v2042_v51, %v865_v39 }
 0x264   : > { %v887_v37 = vadd.f32 %v2047_v53, %v886_v41 }
 0x265   : > { %v867_v25 = vadd.f32 %v2033_v48, %v866_v35 }
 0x266   : > { %v888_v32 = vadd.f32 %v2037_v50, %v887_v37 }
 0x267   : > { %v868_v13 = vrot.slane %v867_v25, 4 }
 0x268   : > { %v889_v21 = vrot.slane %v888_v32, 4 }
 0x269   : > { %v869_v59 = vadd.f32 %v868_v13, %v867_v25 }
 0x26a   : > { %v890_v46 = vadd.f32 %v889_v21, %v888_v32 }
 0x26b   : > { %v870_v23 = vrot.slane %v869_v59, 2 }
 0x26c   : > { %v891_v8 = vrot.slane %v890_v46, 2 }
 0x26d   : > { %v871_v55 = vadd.f32 %v870_v23, %v869_v59 }
 0x26e   : > { %v892_v47 = vadd.f32 %v891_v8, %v890_v46 }
 0x26f   : > { %v872_v19 = vrot.slane %v871_v55, 1 }
 0x270   : > { %v893_v56 = vrot.slane %v892_v47, 1 }
 0x271   : > { %v873_v29 = vadd.f32 %v872_v19, %v871_v55 }
 0x272   : > { %v894_v9 = vadd.f32 %v893_v56, %v892_v47 }
 0x273   : > { %1450 = vrcp.f32 %v873_v29 }
 0x274   : > { %1452 = vrcp.f32 %v894_v9 }
 0x279   : > { %v1451_v51 = vpop.eup %1450 }
 0x27a   : > { %v1453_v48 = vpop.eup %1452 }
 0x2cd   : > { %v912_v53 = vpop.f32.mrf.mxu2 }
 0x2ce   : > { %v955_v49 = vmul.f32 %v1451_v51, %v912_v53  ;;  %v941_v50 = vpop.f32.mrf.mxu3 }
 0x2cf   : > { %v959_v57 = vmul.f32 %v1453_v48, %v941_v50 }
 0x2d0   : > { %963 = vst [vmem:[%s381_s24] sm:$0xff] %v955_v49 }
 0x2d1   : > { %967 = vst [vmem:[%s381_s24 + $0x20] sm:$0xff] %v959_v57 }
 0x2d5   : > { %v915_v30 = vpop.f32.mrf.mxu2 }
 0x2d6   : > { %v956_v33 = vmul.f32 %v1451_v51, %v915_v30  ;;  %v944_v5 = vpop.f32.mrf.mxu3 }
 0x2d7   : > { %v960_v15 = vmul.f32 %v1453_v48, %v944_v5 }
 0x2d8   : > { %964 = vst [vmem:[%s381_s24 + $0x8] sm:$0xff] %v956_v33 }
 0x2d9   : > { %968 = vst [vmem:[%s381_s24 + $0x28] sm:$0xff] %v960_v15 }
 0x2dd   : > { %v918_v26 = vpop.f32.mrf.mxu2 }
 0x2de   : > { %v957_v52 = vmul.f32 %v1451_v51, %v918_v26  ;;  %v947_v11 = vpop.f32.mrf.mxu3 }
 0x2df   : > { %v961_v54 = vmul.f32 %v1453_v48, %v947_v11 }
 0x2e0   : > { %965 = vst [vmem:[%s381_s24 + $0x10] sm:$0xff] %v957_v52 }
 0x2e1   : > { %969 = vst [vmem:[%s381_s24 + $0x30] sm:$0xff] %v961_v54 }
 0x2e5   : > { %v921_v14 = vpop.f32.mrf.mxu2 }
 0x2e6   : > { %v958_v18 = vmul.f32 %v1451_v51, %v921_v14  ;;  %v950_v7 = vpop.f32.mrf.mxu3 }
 0x2e7   : > { %v962_v20 = vmul.f32 %v1453_v48, %v950_v7 }
 0x2e8   : > { %966 = vst [vmem:[%s381_s24 + $0x18] sm:$0xff] %v958_v18 }
 0x2e9   : > { %970 = vst [vmem:[%s381_s24 + $0x38] sm:$0xff] %v962_v20 }
 0x2ea   : > { %s1215_s6 = sshll.u32 %s1556_s21, 5  ;;  %s997_s30 = sshll.u32 %s381_s24, 4  ;;  %s998_s30 = int_to_ptr.vmem [resolvable:$true] %s997_s30 }
 0x2eb   : > { %s2245_s12 = sld [smem:[#allocation33_spill]]  ;;  %s1584_s3 = smov 512  }
 0x2ec   : > { %1251 = sst [smem:[#allocation16]] (%p1756_p10), %s1584_s3  ;;  %s1585_s22 = smov 1024  }
 0x2ed   : > { %1252 = sst [smem:[#allocation16 + $0x1]] (%p1756_p10), %s1585_s22  ;;  %s1586_s26 = smov 4  }
 0x2ee   : > { %1253 = sst [smem:[#allocation16 + $0x2]] (%p1756_p10), %s1586_s26  ;;  %s1587_s21 = smov 128  }
 0x2ef   : > { %1254 = sst [smem:[#allocation16 + $0x3]] (%p1756_p10), %s1587_s21  ;;  %s1588_s9 = smov 8  }
 0x2f0   : > { %1255 = sst [smem:[#allocation16 + $0x4]] (%p1756_p10), %s1587_s21  ;;  %s1589_s8 = smov [#allocation15]  }
 0x2f1   : > { %s986_s15 = scalar_lea.hbm %s2245_s12, %s1215_s6  ;;  %1256 = sst [smem:[#allocation16 + $0x5]] (%p1756_p10), %s1588_s9 }
 0x2f2   : > { %s999_s25 = sshll.u32 %s986_s15, 4  ;;  %s1590_s11 = smov 0   ;;  %s1000_s25 = int_to_ptr.hbm [resolvable:$true] %s999_s25 }
 0x2f3   : > { %1257 = dma.general (%p1756_p10), %s998_s30, 1024, %s1000_s25, %s972_s27, %s1589_s8, [#allocation16], %s1590_s11, 0  }
 0x2f4 PF: > { %s2246_s20 = sld [smem:[#allocation24_spill]]  ;;  %p1260_p11 = pnand %p1154_p2, %p1765_p13 }
 0x2f6   : > { %p1261_p12 = pneg %p1260_p11 }
 0x2fa   : > { %s1027_s18 = sand.u32 1, %s2246_s20  }
 0x2fb   : > { %s1028_s5 = scalar_lea.sflag [#allocation4], %s1027_s18 }
 0x2fc   : > { %1515 = dma.done.wait (%p1261_p12), %s1028_s5, 1024  }
 0x2fd   : > { %1517 = vsyncadd (%p1261_p12), %s1028_s5, 4294966272  ;;  %s22_s23 = sadd.s32 1, %s1564_s23   ;;  %s2248_s7 = sld [smem:[#allocation30_spill]] }
 0x2fe   : > { %p19_p0 = scmp.ge.s32.totalorder %s22_s23, 4   ;;  %s2249_s10 = sld [smem:[#allocation29_spill]] }
 0x2ff   : > { %s2250_s4 = sld [smem:[#allocation25_spill]]  ;;  %s2254_s12 = smov %s1524_s13 }
 0x300   : > { %s2251_s20 = sld [smem:[#allocation28_spill]]  ;;  %s2255_s13 = smov %s1528_s14 }
 0x301   : > { %s2252_s21 = sld [smem:[#allocation26_spill]]  ;;  %s2257_s15 = smov %s1536_s16 }
 0x302   : > { %s2253_s22 = sld [smem:[#allocation27_spill]]  ;;  %s2258_s16 = smov %s1540_s17 }
 0x303   : > { %s2256_s14 = smov %s2248_s7  ;;  %s2260_s18 = smov %s1548_s19 }
 0x304   : > { %s2259_s17 = smov %s2249_s10  ;;  %21 = sbr.rel (!%p19_p0) target bundleno = 14 (0xe), region = 121 }
 0x305   : > { %s2261_s19 = smov %s2250_s4 }
 0x309   :  { %1034 = vsyncpa [#allocation3], 1 }
 0x30a   :  { %1036 = vsyncpa [#allocation3 + $0x1], 1 }
 0x30b   :  { %1037 = vsyncpa [#allocation6], 1 }
 0x30c   :  { %1039 = vsyncpa [#allocation6 + $0x1], 1 }
 0x30d   :  { %1040 = vsyncpa [#allocation4], 1 }
 0x30e   :  { %1042 = vsyncpa [#allocation4 + $0x1], 1 }

</bundles_post_ra>
